<compile_context>
chip_gen: v7x
topology: tpu7x:2x2x1
jax: 0.10.0
libtpu: 0.0.40
codegen_flags: <defaults>
</compile_context>

<pallas_src>
import functools

import jax
import jax.numpy as jnp
from jax.experimental import pallas as pl
from jax.experimental.pallas import tpu as pltpu

_SUBLANE = 8            # vreg sublane count (second-to-last dim alignment)
_MIN_ROWS_FOR_SPLIT = 2048   # only force >=2 tiles (v7x megacore) past this size


def _round_up(x, m):
    return (x + m - 1) // m * m


def _cdiv(a, b):
    return (a + b - 1) // b


def _mlp_kernel(x_ref, w1_ref, b1_ref, w2_ref, b2_ref, o_ref):
    # fc1: (tb, in_dim) @ (in_dim, hid) with f32 MXU accumulation.
    h = jnp.dot(x_ref[...], w1_ref[...], preferred_element_type=jnp.float32)
    # bias + ReLU on the VPU.
    h = jnp.maximum(h + b1_ref[...], 0.0)
    # dropout: identity in inference mode.
    # fc2: (tb, hid) @ (hid, out_dim), f32 accumulation, bias add, store.
    out = jnp.dot(h.astype(w2_ref.dtype), w2_ref[...],
                  preferred_element_type=jnp.float32)
    o_ref[...] = (out + b2_ref[...]).astype(o_ref.dtype)


@functools.partial(jax.jit, static_argnames=("block_batch",))
def anomaly_detection_forward(x, w1, b1, w2, b2, *, block_batch=32768):
    """Fused fc1 -> ReLU -> (dropout=identity) -> fc2 forward pass.

    x : (batch, input_dim) float32
    w1: (input_dim, hidden_dim)   (transpose of torch fc1.weight)
    b1: (1, hidden_dim)
    w2: (hidden_dim, output_dim)  (transpose of torch fc2.weight)
    b2: (1, output_dim)
    Returns (batch, output_dim) float32.
    """
    batch, in_dim = x.shape
    hid = w1.shape[1]
    out_dim = w2.shape[1]

    # ---- batch tiling (all static under jit) --------------------------------
    # Sublane-align the batch, cap the tile at block_batch, then re-derive the
    # tile so padding is < one sublane per tile (avoids the last-tile blowup
    # of round_up(batch, tb) when batch is just above a tile multiple).
    batch_s = _round_up(batch, _SUBLANE)
    tb_cap = min(block_batch, batch_s)
    n_tiles = _cdiv(batch_s, tb_cap)
    if n_tiles == 1 and batch_s >= _MIN_ROWS_FOR_SPLIT:
        # Ensure >= 2 grid steps so both v7x TensorCores get work.
        n_tiles = 2
    tb = _round_up(_cdiv(batch_s, n_tiles), _SUBLANE)
    batch_p = n_tiles * tb

    # Pad batch rows only when needed (padded rows are sliced off at the end).
    if batch_p != batch:
        xp = jnp.zeros((batch_p, in_dim), x.dtype).at[:batch, :].set(x)
    else:
        xp = x

    # ---- cost estimate (advisory, for XLA scheduling) ------------------------
    isz = jnp.dtype(x.dtype).itemsize
    flops = 2 * batch_p * (in_dim * hid + hid * out_dim)
    bytes_accessed = (batch_p * in_dim * isz            # x read
                      + in_dim * hid * 4 + hid * 4      # w1, b1
                      + hid * out_dim * 4 + out_dim * 4 # w2, b2
                      + batch_p * out_dim * 4)          # output write
    cost = pl.CostEstimate(flops=flops, transcendentals=0,
                           bytes_accessed=bytes_accessed)

    out_p = pl.pallas_call(
        _mlp_kernel,
        out_shape=jax.ShapeDtypeStruct((batch_p, out_dim), jnp.float32),
        grid=(n_tiles,),
        in_specs=[
            # x: one batch tile per grid step (double-buffered by the pipeline);
            # last dim == full array dim, so no lane padding is required.
            pl.BlockSpec((tb, in_dim), lambda i: (i, 0)),
            # weights / biases: constant index_map -> DMA'd once, VMEM-resident.
            pl.BlockSpec((in_dim, hid), lambda i: (0, 0)),
            pl.BlockSpec((1, hid), lambda i: (0, 0)),
            pl.BlockSpec((hid, out_dim), lambda i: (0, 0)),
            pl.BlockSpec((1, out_dim), lambda i: (0, 0)),
        ],
        # Unpadded output tile: out_dim < 128 gives masked stores, but the
        # store slot has huge slack; HBM write bytes drop 16x vs lane padding.
        out_specs=pl.BlockSpec((tb, out_dim), lambda i: (i, 0)),
        compiler_params=pltpu.CompilerParams(
            # Batch axis is independent -> shard across the 2 TCs on v7x.
            dimension_semantics=("parallel",),
        ),
        cost_estimate=cost,
    )(xp, w1, b1, w2, b2)

    return out_p[:batch, :] if batch_p != batch else out_p


def init_params(key, input_dim, hidden_dim, output_dim, dtype=jnp.float32):
    """Deterministic synthetic parameters (torch-Linear-like fan-in uniform init)."""
    k1, k2, k3, k4 = jax.random.split(key, 4)
    s1 = 1.0 / jnp.sqrt(input_dim)
    s2 = 1.0 / jnp.sqrt(hidden_dim)
    w1 = jax.random.uniform(k1, (input_dim, hidden_dim), dtype, -s1, s1)
    b1 = jax.random.uniform(k2, (1, hidden_dim), dtype, -s1, s1)
    w2 = jax.random.uniform(k3, (hidden_dim, output_dim), dtype, -s2, s2)
    b2 = jax.random.uniform(k4, (1, output_dim), dtype, -s2, s2)
    return w1, b1, w2, b2


def _reference(x, w1, b1, w2, b2):
    return jnp.maximum(x @ w1 + b1, 0.0) @ w2 + b2


if __name__ == "__main__":
    # Small shapes consistent with the module: batch=8, input_dim=16,
    # hidden_dim=32, output_dim=8, dropout=0.1 (identity at inference).
    batch, input_dim, hidden_dim, output_dim = 8, 16, 32, 8

    key = jax.random.PRNGKey(0)
    kx, kp = jax.random.split(key)
    x = jax.random.normal(kx, (batch, input_dim), jnp.float32)
    w1, b1, w2, b2 = init_params(kp, input_dim, hidden_dim, output_dim)

    out = anomaly_detection_forward(x, w1, b1, w2, b2)
    out = jax.block_until_ready(out)

    ref = _reference(x, w1, b1, w2, b2)
    assert out.shape == (batch, output_dim)
    assert jnp.allclose(out, ref, atol=1e-4, rtol=1e-4), (
        float(jnp.max(jnp.abs(out - ref))))

    # Second check: non-tile-multiple batch with a small block_batch to exercise
    # the multi-tile + batch-padding path (tb=56, n_tiles=4, 24 padded rows).
    batch2 = 200
    x2 = jax.random.normal(jax.random.PRNGKey(1), (batch2, input_dim), jnp.float32)
    out2 = anomaly_detection_forward(x2, w1, b1, w2, b2, block_batch=64)
    out2 = jax.block_until_ready(out2)
    ref2 = _reference(x2, w1, b1, w2, b2)
    assert out2.shape == (batch2, output_dim)
    assert jnp.allclose(out2, ref2, atol=1e-4, rtol=1e-4), (
        float(jnp.max(jnp.abs(out2 - ref2))))

    print("KERNEL_OK")
</pallas_src>

<mosaic_0001>
module attributes {stable_mosaic.version = 11 : i64} {
  func.func @_mlp_kernel(%arg0: i32, %arg1: memref<8x16xf32, #tpu.memory_space<vmem>>, %arg2: memref<16x32xf32, #tpu.memory_space<vmem>>, %arg3: memref<1x32xf32, #tpu.memory_space<vmem>>, %arg4: memref<32x8xf32, #tpu.memory_space<vmem>>, %arg5: memref<1x8xf32, #tpu.memory_space<vmem>>, %arg6: memref<8x8xf32, #tpu.memory_space<vmem>>) attributes {dimension_semantics = [#tpu.dimension_semantics<parallel>], iteration_bounds = array<i64: 1>, scalar_prefetch = 0 : i64, scratch_operands = 0 : i64, tpu.core_type = #tpu.core_type<tc>, window_params = [{transform_indices = @transform_0, window_bounds = array<i64: 8, 16>}, {pipeline_mode = #tpu.pipeline_mode<synchronous>, transform_indices = @transform_1, window_bounds = array<i64: 16, 32>}, {pipeline_mode = #tpu.pipeline_mode<synchronous>, transform_indices = @transform_2, window_bounds = array<i64: 1, 32>}, {pipeline_mode = #tpu.pipeline_mode<synchronous>, transform_indices = @transform_3, window_bounds = array<i64: 32, 8>}, {pipeline_mode = #tpu.pipeline_mode<synchronous>, transform_indices = @transform_4, window_bounds = array<i64: 1, 8>}, {transform_indices = @transform_5, window_bounds = array<i64: 8, 8>}]} {
    %c0 = arith.constant 0 : index
    %c0_0 = arith.constant 0 : index
    %0 = vector.load %arg1[%c0, %c0_0] : memref<8x16xf32, #tpu.memory_space<vmem>>, vector<8x16xf32>
    %c0_1 = arith.constant 0 : index
    %c0_2 = arith.constant 0 : index
    %1 = vector.load %arg2[%c0_1, %c0_2] : memref<16x32xf32, #tpu.memory_space<vmem>>, vector<16x32xf32>
    %cst = arith.constant dense<0.000000e+00> : vector<8x32xf32>
    %2 = tpu.matmul %0, %1, %cst {dimension_numbers = #tpu.dot_dimension_numbers<[1], [0], [0], [1], [0, 0, 1, 1], [], []>} : vector<8x16xf32>, vector<16x32xf32>, vector<8x32xf32> -> vector<8x32xf32>
    %c0_3 = arith.constant 0 : index
    %c0_4 = arith.constant 0 : index
    %3 = vector.load %arg3[%c0_3, %c0_4] : memref<1x32xf32, #tpu.memory_space<vmem>>, vector<1x32xf32>
    %4 = vector.broadcast %3 : vector<1x32xf32> to vector<8x32xf32>
    %5 = arith.addf %2, %4 : vector<8x32xf32>
    %cst_5 = arith.constant 0.000000e+00 : f32
    %6 = vector.broadcast %cst_5 : f32 to vector<8x32xf32>
    %7 = arith.maximumf %5, %6 : vector<8x32xf32>
    %c0_6 = arith.constant 0 : index
    %c0_7 = arith.constant 0 : index
    %8 = vector.load %arg4[%c0_6, %c0_7] : memref<32x8xf32, #tpu.memory_space<vmem>>, vector<32x8xf32>
    %cst_8 = arith.constant dense<0.000000e+00> : vector<8x8xf32>
    %9 = tpu.matmul %7, %8, %cst_8 {dimension_numbers = #tpu.dot_dimension_numbers<[1], [0], [0], [1], [0, 0, 1, 1], [], []>} : vector<8x32xf32>, vector<32x8xf32>, vector<8x8xf32> -> vector<8x8xf32>
    %c0_9 = arith.constant 0 : index
    %c0_10 = arith.constant 0 : index
    %10 = vector.load %arg5[%c0_9, %c0_10] : memref<1x8xf32, #tpu.memory_space<vmem>>, vector<1x8xf32>
    %11 = vector.broadcast %10 : vector<1x8xf32> to vector<8x8xf32>
    %12 = arith.addf %9, %11 : vector<8x8xf32>
    %c0_11 = arith.constant 0 : index
    %c0_12 = arith.constant 0 : index
    %13 = vector.load %arg6[%c0_11, %c0_12] : memref<8x8xf32, #tpu.memory_space<vmem>>, vector<8x8xf32>
    tpu.vector_store %arg6[%c0_11, %c0_12], %12 {strides = array<i32>} : memref<8x8xf32, #tpu.memory_space<vmem>>, vector<8x8xf32>,
    return
  }
  func.func @transform_0(%arg0: i32) -> (i32, i32) {
    %c0_i32 = arith.constant 0 : i32
    %c0_i32_0 = arith.constant 0 : i32
    return %arg0, %c0_i32 : i32, i32
  }
  func.func @transform_1(%arg0: i32) -> (i32, i32) {
    %c0_i32 = arith.constant 0 : i32
    %c0_i32_0 = arith.constant 0 : i32
    %c0_i32_1 = arith.constant 0 : i32
    return %c0_i32, %c0_i32_0 : i32, i32
  }
  func.func @transform_2(%arg0: i32) -> (i32, i32) {
    %c0_i32 = arith.constant 0 : i32
    %c0_i32_0 = arith.constant 0 : i32
    %c0_i32_1 = arith.constant 0 : i32
    return %c0_i32, %c0_i32_0 : i32, i32
  }
  func.func @transform_3(%arg0: i32) -> (i32, i32) {
    %c0_i32 = arith.constant 0 : i32
    %c0_i32_0 = arith.constant 0 : i32
    %c0_i32_1 = arith.constant 0 : i32
    return %c0_i32, %c0_i32_0 : i32, i32
  }
  func.func @transform_4(%arg0: i32) -> (i32, i32) {
    %c0_i32 = arith.constant 0 : i32
    %c0_i32_0 = arith.constant 0 : i32
    %c0_i32_1 = arith.constant 0 : i32
    return %c0_i32, %c0_i32_0 : i32, i32
  }
  func.func @transform_5(%arg0: i32) -> (i32, i32) {
    %c0_i32 = arith.constant 0 : i32
    %c0_i32_0 = arith.constant 0 : i32
    return %arg0, %c0_i32 : i32, i32
  }
}

</mosaic_0001>

<bundles_post_ra>
// kernel: anomaly_detection_forward.1
= control target key start
LH: loop header
LB: loop body
LE: loop exit
PB: predicated region body
PF: predicated region fallthrough
CT: control target
= control target key end

     0   :  { %v274_v2 = vmov 0.0|0.0   ;;  %vm275_vm0 = vmmov 0   ;;  %v276_v4 = vmov 0.0   ;;  %s347_s0 = inlined_call_operand.vmem [shape: f32[8,16], index: 0, kind: input, shape index: {}]   ;;  %s348_s1 = inlined_call_operand.vmem [shape: f32[16,32], index: 1, kind: input, shape index: {}]   ;;  %s349_s2 = inlined_call_operand.vmem [shape: f32[1,32], index: 2, kind: input, shape index: {}]   ;;  %s350_s3 = inlined_call_operand.vmem [shape: f32[32,8], index: 3, kind: input, shape index: {}]   ;;  %s351_s4 = inlined_call_operand.vmem [shape: f32[1,8], index: 4, kind: input, shape index: {}]   ;;  %s352_s5 = inlined_call_operand.hbm [shape: f32[8,8], index: 5, kind: output, shape index: {}]  }
   0x1   :  { %v22_v0 = vld [vmem:[%s348_s1] sm:$0xff]  ;;  %v23_v1 = vld [vmem:[%s348_s1 + $0x8] sm:$0xff]  ;;  %237 = vmatprep.subr.bf16.mxu0 %v274_v2  ;;  %223 = vmatprep.mubr.msk.f32.mxu0 %vm275_vm0, %v276_v4 }
   0x2   :  { %v238_v3 = vpack.c.bf16 %v23_v1, %v22_v0  ;;  %v106_v5 = vld [vmem:[%s350_s3] sm:$0xff]  ;;  %v107_v6 = vld [vmem:[%s350_s3 + $0x8] sm:$0xff]  ;;  %240 = vmatprep.subr.bf16.mxu1 %v274_v2  ;;  %234 = vmatprep.mubr.msk.f32.mxu1 %vm275_vm0, %v276_v4 }
   0x3   :  { %v241_v7 = vpack.c.bf16 %v107_v6, %v106_v5 }
   0x4   :  { %10 = vsyncpa [#allocation3], 0  ;;  %239 = vmatpush3.bf16.msra.mxu0 %v238_v3  ;;  %v21_v8 = vld [vmem:[%s347_s0] sm:$0xff]  ;;  %vm31_vm1 = vcmask 130048   ;;  %v108_v9 = vld [vmem:[%s350_s3 + $0x10] sm:$0xff]  ;;  %vm117_vm2 = vcmask 261120  }
   0x5   :  { %242 = vmatpush3.bf16.msra.mxu1 %v241_v7  ;;  %v109_v10 = vld [vmem:[%s350_s3 + $0x18] sm:$0xff]  ;;  %v207_v12 = vld [vmem:[%s349_s2] ss:$0 sm:$0xff]  ;;  %s277_s9 = smov [#allocation2]   ;;  %vm191_vm3 = vcmask 64512  }
   0x6   :  { %243 = vmatprep.subr.bf16.mxu1 %v274_v2  ;;  %v244_v11 = vpack.c.bf16 %v109_v10, %v108_v9  ;;  %v209_v17 = vld [vmem:[%s351_s4] ss:$0 sm:$0xff]  ;;  %s199_s10 = sshll.u32 %s277_s9, 4  ;;  %s200_s10 = int_to_ptr.vmem [resolvable:$true] %s199_s10 }
   0x7   :  { %224 = vmatmul.mubr.msk.f32.vlgmr.msra.gmra.mrb[0].mxu0 %vm31_vm1, %v21_v8  ;;  %s250_s3 = scalar_lea.vmem %s200_s10, 128  ;;  %p255_p1 = scmp.lt.s32.totalorder %s200_s10, %s200_s10 }
   0x8   :  { %p251_p0 = scmp.ne.s32.totalorder %s200_s10, %s250_s3  ;;  %p256_p2 = scmp.lt.s32.totalorder %s250_s3, %s250_s3 }
   0x9   :  { %245 = vmatpush3.bf16.msra.mxu1 %v244_v11 }
   0xa   :  { %p257_p3 = por %p256_p2, %p255_p1 }
   0xc   :  { %p258_p4 = pnand %p257_p3, %p251_p0 }
  0xda   :  { %v101_v13 = vpop.f32.mrb[0].mxu0 }
  0xdb   :  { %v102_v14 = vadd.f32 %v207_v12, %v101_v13  ;;  %v225_v15 = vpop.f32.mrb[1].mxu0 }
  0xdd   :  { %v105_v16 = vmax.f32 %v102_v14, 0.0 }
  0xdf   :  { %235 = vmatmul.mubr.msk.f32.vlgmr.msra.gmra.mrb[0].mxu1 %vm117_vm2, %v105_v16 }
 0x1b2   :  { %v187_v18 = vpop.f32.mrb[0].mxu1 }
 0x1b3   :  { %v188_v19 = vadd.f32 %v209_v17, %v187_v18  ;;  %v236_v20 = vpop.f32.mrb[1].mxu1 }
 0x1b5   :  { %192 = vst.msk [vmem:[#allocation2] sm:$0xff] %vm191_vm3, %v188_v19 }
 0x1b6   :  { %261 = shalt.err (!%p258_p4)
}
 0x1b7   :  { %s262_s12 = scalar_lea.hbm %s352_s5, 128 }
 0x1b8   :  { %p263_p5 = scmp.ne.s32.totalorder %s352_s5, %s262_s12  ;;  %p266_p6 = scmp.lt.u32.totalorder %s262_s12, %s352_s5 }
 0x1ba   :  { %p268_p7 = pnand %p266_p6, %p263_p5 }
 0x1bc   :  { %271 = shalt.err (!%p268_p7)
}
 0x1bd   :  { %202 = dma.vmem_to_hbm [thread:$0]  %s200_s10, 128, %s352_s5, [#allocation3]  }
 0x1be   :  { %272 = dma.done.wait [#allocation3], 128  }
 0x1bf   :  { %273 = vsyncadd [#allocation3], 4294967168 }
 0x1c0   :  { %206 = vsyncpa [#allocation3], 1 }

</bundles_post_ra>
